<compile_context>
chip_gen: v7x
topology: tpu7x:2x2x1
jax: 0.10.0
libtpu: 0.0.40
codegen_flags: <defaults>
</compile_context>

<pallas_src>
import functools

import jax
import jax.numpy as jnp
import numpy as np
from jax import lax
from jax.experimental import pallas as pl
from jax.experimental.pallas import tpu as pltpu

# --- small, shape-consistent config (original: n_embd=400, n_head=16, block_size=100) ---
N_EMBD = 32
N_HEAD = 4
HEAD_SIZE = N_EMBD // N_HEAD   # 8
BATCH = 2
SEQ = 8                        # T <= block_size
FF_HIDDEN = 4 * N_EMBD         # 128
LN_EPS = 1e-5


def _layernorm(x, gamma, beta):
    mu = jnp.mean(x, axis=-1, keepdims=True)
    var = jnp.mean((x - mu) ** 2, axis=-1, keepdims=True)
    return (x - mu) * lax.rsqrt(var + LN_EPS) * gamma + beta


def block_kernel(x_ref, wqkv_ref, wp_ref, w1_ref, w2_ref, vecs_ref, b1_ref,
                 bias_ref, o_ref, *, n_head):
    x = x_ref[...]                       # (B*T, C) f32
    _, C = x.shape
    hs = C // n_head
    # NOTE: PyTorch Head scales by C**-0.5 with C = n_embd (not head_size).
    scale = 1.0 / (C ** 0.5)

    vecs = vecs_ref[...]                 # (6, C) f32: ln1g, ln1b, ln2g, ln2b, bp, b2
    ln1g, ln1b = vecs[0:1], vecs[1:2]
    ln2g, ln2b = vecs[2:3], vecs[3:4]
    bp, b2 = vecs[4:5], vecs[5:6]

    # ---- x = x + sa(ln1(x)) ----
    h = _layernorm(x, ln1g, ln1b)
    qkv = jnp.dot(h.astype(jnp.bfloat16), wqkv_ref[...],
                  preferred_element_type=jnp.float32)           # (B*T, 3C) f32

    # Stack heads into a leading batch axis: (n_head, B*T, hs).
    def heads(base):
        return jnp.stack(
            [qkv[:, base + i * hs: base + (i + 1) * hs] for i in range(n_head)],
            axis=0)

    q_h = heads(0).astype(jnp.bfloat16)
    k_h = heads(C).astype(jnp.bfloat16)
    v_h = heads(2 * C).astype(jnp.bfloat16)

    # Scores for all heads in one batched matmul: (n_head, B*T, B*T).
    s = jnp.einsum('htd,hsd->hts', q_h, k_h,
                   preferred_element_type=jnp.float32) * scale
    # Additive bias: 0 where (same sequence AND causal), -inf elsewhere.
    s = s + bias_ref[...]

    m = jnp.max(s, axis=-1, keepdims=True)       # diagonal is always unmasked
    e = jnp.exp(s - m)
    denom = jnp.sum(e, axis=-1, keepdims=True)
    p = e * pl.reciprocal(denom, approx=True)    # softmax over keys (dropout = identity)

    ctx = jnp.einsum('hts,hsd->htd', p.astype(jnp.bfloat16), v_h,
                     preferred_element_type=jnp.float32)        # (n_head, B*T, hs)
    sa = jnp.concatenate([ctx[i] for i in range(n_head)], axis=-1)   # (B*T, C)
    sa = jnp.dot(sa.astype(jnp.bfloat16), wp_ref[...],
                 preferred_element_type=jnp.float32) + bp
    x1 = x + sa                                  # residual 1 (dropout = identity)

    # ---- x = x + ffwd(ln2(x)) ----
    h2 = _layernorm(x1, ln2g, ln2b)
    ff = jnp.dot(h2.astype(jnp.bfloat16), w1_ref[...],
                 preferred_element_type=jnp.float32) + b1_ref[...]
    ff = jnp.maximum(ff, 0.0)                    # ReLU
    ff = jnp.dot(ff.astype(jnp.bfloat16), w2_ref[...],
                 preferred_element_type=jnp.float32) + b2

    o_ref[...] = x1 + ff                         # residual 2 (dropout = identity)


def transformer_block(x, params):
    (ln1g, ln1b, wq, wk, wv, wp, bp, ln2g, ln2b, w1, b1, w2, b2) = params
    B, T, C = x.shape

    # Host-side packing (free): fused QKV weight, bf16 weights (halves DMA
    # bytes), packed small vectors, precomputed additive attention mask.
    wqkv = jnp.concatenate([wq, wk, wv], axis=1).astype(jnp.bfloat16)   # (C, 3C)
    wp_b = wp.astype(jnp.bfloat16)
    w1_b = w1.astype(jnp.bfloat16)
    w2_b = w2.astype(jnp.bfloat16)
    vecs = jnp.concatenate([ln1g, ln1b, ln2g, ln2b, bp, b2], axis=0)    # (6, C)

    idx = jnp.arange(B * T, dtype=jnp.int32)
    same_seq = (idx[:, None] // T) == (idx[None, :] // T)
    causal = idx[:, None] >= idx[None, :]
    attn_bias = jnp.where(same_seq & causal, 0.0, -jnp.inf).astype(jnp.float32)

    x2 = x.reshape(B * T, C)

    in_specs = [pl.BlockSpec(memory_space=pltpu.MemorySpace.VMEM) for _ in range(8)]
    out_spec = pl.BlockSpec(memory_space=pltpu.MemorySpace.VMEM)

    out = pl.pallas_call(
        functools.partial(block_kernel, n_head=N_HEAD),
        out_shape=jax.ShapeDtypeStruct((B * T, C), jnp.float32),
        in_specs=in_specs,
        out_specs=out_spec,
    )(x2, wqkv, wp_b, w1_b, w2_b, vecs, b1, attn_bias)
    return out.reshape(B, T, C)


def init_params(key):
    C, H = N_EMBD, FF_HIDDEN
    ks = jax.random.split(key, 8)
    scale = 0.05
    wq = scale * jax.random.normal(ks[0], (C, C), jnp.float32)
    wk = scale * jax.random.normal(ks[1], (C, C), jnp.float32)
    wv = scale * jax.random.normal(ks[2], (C, C), jnp.float32)
    wp = scale * jax.random.normal(ks[3], (C, C), jnp.float32)
    bp = scale * jax.random.normal(ks[4], (1, C), jnp.float32)
    w1 = scale * jax.random.normal(ks[5], (C, H), jnp.float32)
    b1 = scale * jax.random.normal(ks[6], (1, H), jnp.float32)
    w2 = scale * jax.random.normal(ks[7], (H, C), jnp.float32)
    b2 = jnp.zeros((1, C), jnp.float32)
    ln1g = jnp.ones((1, C), jnp.float32)
    ln1b = jnp.zeros((1, C), jnp.float32)
    ln2g = jnp.ones((1, C), jnp.float32)
    ln2b = jnp.zeros((1, C), jnp.float32)
    return (ln1g, ln1b, wq, wk, wv, wp, bp, ln2g, ln2b, w1, b1, w2, b2)


def reference_block(x, params):
    """Pure-f32 JAX reference matching the PyTorch module (dropout = identity)."""
    (ln1g, ln1b, wq, wk, wv, wp, bp, ln2g, ln2b, w1, b1, w2, b2) = params
    B, T, C = x.shape

    def ln(z, g, b):
        mu = jnp.mean(z, -1, keepdims=True)
        var = jnp.mean((z - mu) ** 2, -1, keepdims=True)
        return (z - mu) / jnp.sqrt(var + LN_EPS) * g + b

    h = ln(x, ln1g, ln1b)
    q = h @ wq; k = h @ wk; v = h @ wv
    q = q.reshape(B, T, N_HEAD, HEAD_SIZE).transpose(0, 2, 1, 3)
    k = k.reshape(B, T, N_HEAD, HEAD_SIZE).transpose(0, 2, 1, 3)
    v = v.reshape(B, T, N_HEAD, HEAD_SIZE).transpose(0, 2, 1, 3)
    wei = (q @ jnp.swapaxes(k, -2, -1)) * (C ** -0.5)
    mask = jnp.tril(jnp.ones((T, T), bool))
    wei = jnp.where(mask, wei, -jnp.inf)
    wei = jax.nn.softmax(wei, axis=-1)
    sa = (wei @ v).transpose(0, 2, 1, 3).reshape(B, T, C)
    sa = sa @ wp + bp
    x1 = x + sa
    h2 = ln(x1, ln2g, ln2b)
    ff = jnp.maximum(h2 @ w1 + b1, 0.0) @ w2 + b2
    return x1 + ff


if __name__ == "__main__":
    key = jax.random.PRNGKey(0)
    kx, kp = jax.random.split(key)
    x = jax.random.normal(kx, (BATCH, SEQ, N_EMBD), jnp.float32)
    params = init_params(kp)

    out = transformer_block(x, params)
    out = jax.block_until_ready(out)

    ref = reference_block(x, params)
    # Kernel uses bf16 matmul operands with f32 accumulation (MXU-native), so
    # compare against the f32 reference with a correspondingly looser tolerance.
    np.testing.assert_allclose(np.asarray(out), np.asarray(ref), rtol=2e-2, atol=2e-2)

    print("KERNEL_OK")
</pallas_src>

<mosaic_0001>
module attributes {stable_mosaic.version = 11 : i64} {
  func.func @block_kernel(%arg0: memref<16x32xf32, #tpu.memory_space<vmem>>, %arg1: memref<32x96xbf16, #tpu.memory_space<vmem>>, %arg2: memref<32x32xbf16, #tpu.memory_space<vmem>>, %arg3: memref<32x128xbf16, #tpu.memory_space<vmem>>, %arg4: memref<128x32xbf16, #tpu.memory_space<vmem>>, %arg5: memref<6x32xf32, #tpu.memory_space<vmem>>, %arg6: memref<1x128xf32, #tpu.memory_space<vmem>>, %arg7: memref<16x16xf32, #tpu.memory_space<vmem>>, %arg8: memref<16x32xf32, #tpu.memory_space<vmem>>) attributes {dimension_semantics = [], scalar_prefetch = 0 : i64, scratch_operands = 0 : i64, tpu.core_type = #tpu.core_type<tc>} {
    %c0 = arith.constant 0 : index
    %c0_0 = arith.constant 0 : index
    %0 = vector.load %arg0[%c0, %c0_0] : memref<16x32xf32, #tpu.memory_space<vmem>>, vector<16x32xf32>
    %c0_1 = arith.constant 0 : index
    %c0_2 = arith.constant 0 : index
    %1 = vector.load %arg5[%c0_1, %c0_2] : memref<6x32xf32, #tpu.memory_space<vmem>>, vector<6x32xf32>
    %2 = vector.extract_strided_slice %1 {offsets = [0, 0], sizes = [1, 32], strides = [1, 1]} : vector<6x32xf32> to vector<1x32xf32>
    %3 = vector.extract_strided_slice %1 {offsets = [1, 0], sizes = [1, 32], strides = [1, 1]} : vector<6x32xf32> to vector<1x32xf32>
    %4 = vector.extract_strided_slice %1 {offsets = [2, 0], sizes = [1, 32], strides = [1, 1]} : vector<6x32xf32> to vector<1x32xf32>
    %5 = vector.extract_strided_slice %1 {offsets = [3, 0], sizes = [1, 32], strides = [1, 1]} : vector<6x32xf32> to vector<1x32xf32>
    %6 = vector.extract_strided_slice %1 {offsets = [4, 0], sizes = [1, 32], strides = [1, 1]} : vector<6x32xf32> to vector<1x32xf32>
    %7 = vector.extract_strided_slice %1 {offsets = [5, 0], sizes = [1, 32], strides = [1, 1]} : vector<6x32xf32> to vector<1x32xf32>
    %cst = arith.constant dense<0.000000e+00> : vector<16xf32>
    %8 = vector.multi_reduction <add>, %0, %cst [1] : vector<16x32xf32> to vector<16xf32>
    %9 = vector.shape_cast %8 : vector<16xf32> to vector<16x1xf32>
    %cst_3 = arith.constant 3.200000e+01 : f32
    %10 = vector.broadcast %cst_3 : f32 to vector<16x1xf32>
    %11 = arith.divf %9, %10 : vector<16x1xf32>
    %12 = vector.broadcast %11 : vector<16x1xf32> to vector<16x32xf32>
    %13 = arith.subf %0, %12 : vector<16x32xf32>
    %14 = arith.mulf %13, %13 : vector<16x32xf32>
    %cst_4 = arith.constant dense<0.000000e+00> : vector<16xf32>
    %15 = vector.multi_reduction <add>, %14, %cst_4 [1] : vector<16x32xf32> to vector<16xf32>
    %16 = vector.shape_cast %15 : vector<16xf32> to vector<16x1xf32>
    %cst_5 = arith.constant 3.200000e+01 : f32
    %17 = vector.broadcast %cst_5 : f32 to vector<16x1xf32>
    %18 = arith.divf %16, %17 : vector<16x1xf32>
    %19 = vector.broadcast %11 : vector<16x1xf32> to vector<16x32xf32>
    %20 = arith.subf %0, %19 : vector<16x32xf32>
    %cst_6 = arith.constant 9.99999974E-6 : f32
    %21 = vector.broadcast %cst_6 : f32 to vector<16x1xf32>
    %22 = arith.addf %18, %21 : vector<16x1xf32>
    %23 = math.rsqrt %22 : vector<16x1xf32>
    %24 = vector.broadcast %23 : vector<16x1xf32> to vector<16x32xf32>
    %25 = arith.mulf %20, %24 : vector<16x32xf32>
    %26 = vector.broadcast %2 : vector<1x32xf32> to vector<16x32xf32>
    %27 = arith.mulf %25, %26 : vector<16x32xf32>
    %28 = vector.broadcast %3 : vector<1x32xf32> to vector<16x32xf32>
    %29 = arith.addf %27, %28 : vector<16x32xf32>
    %30 = arith.truncf %29 : vector<16x32xf32> to vector<16x32xbf16>
    %c0_7 = arith.constant 0 : index
    %c0_8 = arith.constant 0 : index
    %31 = vector.load %arg1[%c0_7, %c0_8] : memref<32x96xbf16, #tpu.memory_space<vmem>>, vector<32x96xbf16>
    %cst_9 = arith.constant dense<0.000000e+00> : vector<16x96xf32>
    %32 = tpu.matmul %30, %31, %cst_9 {dimension_numbers = #tpu.dot_dimension_numbers<[1], [0], [0], [1], [0, 0, 1, 1], [], []>} : vector<16x32xbf16>, vector<32x96xbf16>, vector<16x96xf32> -> vector<16x96xf32>
    %33 = vector.extract_strided_slice %32 {offsets = [0, 0], sizes = [16, 8], strides = [1, 1]} : vector<16x96xf32> to vector<16x8xf32>
    %34 = vector.extract_strided_slice %32 {offsets = [0, 8], sizes = [16, 8], strides = [1, 1]} : vector<16x96xf32> to vector<16x8xf32>
    %35 = vector.extract_strided_slice %32 {offsets = [0, 16], sizes = [16, 8], strides = [1, 1]} : vector<16x96xf32> to vector<16x8xf32>
    %36 = vector.extract_strided_slice %32 {offsets = [0, 24], sizes = [16, 8], strides = [1, 1]} : vector<16x96xf32> to vector<16x8xf32>
    %37 = vector.shape_cast %33 : vector<16x8xf32> to vector<1x16x8xf32>
    %38 = vector.shape_cast %34 : vector<16x8xf32> to vector<1x16x8xf32>
    %39 = vector.shape_cast %35 : vector<16x8xf32> to vector<1x16x8xf32>
    %40 = vector.shape_cast %36 : vector<16x8xf32> to vector<1x16x8xf32>
    %41 = tpu.concatenate %37, %38, %39, %40 in 0 : vector<1x16x8xf32>, vector<1x16x8xf32>, vector<1x16x8xf32>, vector<1x16x8xf32> -> vector<4x16x8xf32>
    %42 = arith.truncf %41 : vector<4x16x8xf32> to vector<4x16x8xbf16>
    %43 = vector.extract_strided_slice %32 {offsets = [0, 32], sizes = [16, 8], strides = [1, 1]} : vector<16x96xf32> to vector<16x8xf32>
    %44 = vector.extract_strided_slice %32 {offsets = [0, 40], sizes = [16, 8], strides = [1, 1]} : vector<16x96xf32> to vector<16x8xf32>
    %45 = vector.extract_strided_slice %32 {offsets = [0, 48], sizes = [16, 8], strides = [1, 1]} : vector<16x96xf32> to vector<16x8xf32>
    %46 = vector.extract_strided_slice %32 {offsets = [0, 56], sizes = [16, 8], strides = [1, 1]} : vector<16x96xf32> to vector<16x8xf32>
    %47 = vector.shape_cast %43 : vector<16x8xf32> to vector<1x16x8xf32>
    %48 = vector.shape_cast %44 : vector<16x8xf32> to vector<1x16x8xf32>
    %49 = vector.shape_cast %45 : vector<16x8xf32> to vector<1x16x8xf32>
    %50 = vector.shape_cast %46 : vector<16x8xf32> to vector<1x16x8xf32>
    %51 = tpu.concatenate %47, %48, %49, %50 in 0 : vector<1x16x8xf32>, vector<1x16x8xf32>, vector<1x16x8xf32>, vector<1x16x8xf32> -> vector<4x16x8xf32>
    %52 = arith.truncf %51 : vector<4x16x8xf32> to vector<4x16x8xbf16>
    %53 = vector.extract_strided_slice %32 {offsets = [0, 64], sizes = [16, 8], strides = [1, 1]} : vector<16x96xf32> to vector<16x8xf32>
    %54 = vector.extract_strided_slice %32 {offsets = [0, 72], sizes = [16, 8], strides = [1, 1]} : vector<16x96xf32> to vector<16x8xf32>
    %55 = vector.extract_strided_slice %32 {offsets = [0, 80], sizes = [16, 8], strides = [1, 1]} : vector<16x96xf32> to vector<16x8xf32>
    %56 = vector.extract_strided_slice %32 {offsets = [0, 88], sizes = [16, 8], strides = [1, 1]} : vector<16x96xf32> to vector<16x8xf32>
    %57 = vector.shape_cast %53 : vector<16x8xf32> to vector<1x16x8xf32>
    %58 = vector.shape_cast %54 : vector<16x8xf32> to vector<1x16x8xf32>
    %59 = vector.shape_cast %55 : vector<16x8xf32> to vector<1x16x8xf32>
    %60 = vector.shape_cast %56 : vector<16x8xf32> to vector<1x16x8xf32>
    %61 = tpu.concatenate %57, %58, %59, %60 in 0 : vector<1x16x8xf32>, vector<1x16x8xf32>, vector<1x16x8xf32>, vector<1x16x8xf32> -> vector<4x16x8xf32>
    %62 = arith.truncf %61 : vector<4x16x8xf32> to vector<4x16x8xbf16>
    "tpu.trace_start"() <{level = 10 : i32, message = "htd,hsd->hts"}> : () -> ()
    %cst_10 = arith.constant dense<0.000000e+00> : vector<4x16x16xf32>
    %63 = tpu.matmul %42, %52, %cst_10 {dimension_numbers = #tpu.dot_dimension_numbers<[2], [2], [1], [1], [0, 0, 0, 1, 1, 1], [0], [0]>} : vector<4x16x8xbf16>, vector<4x16x8xbf16>, vector<4x16x16xf32> -> vector<4x16x16xf32>
    "tpu.trace_stop"() : () -> ()
    %cst_11 = arith.constant 0.176776692 : f32
    %64 = vector.broadcast %cst_11 : f32 to vector<4x16x16xf32>
    %65 = arith.mulf %63, %64 : vector<4x16x16xf32>
    %c0_12 = arith.constant 0 : index
    %c0_13 = arith.constant 0 : index
    %66 = vector.load %arg7[%c0_12, %c0_13] : memref<16x16xf32, #tpu.memory_space<vmem>>, vector<16x16xf32>
    %67 = vector.shape_cast %66 : vector<16x16xf32> to vector<1x16x16xf32>
    %68 = vector.broadcast %67 : vector<1x16x16xf32> to vector<4x16x16xf32>
    %69 = arith.addf %65, %68 : vector<4x16x16xf32>
    %cst_14 = arith.constant dense<0xFF800000> : vector<4x16xf32>
    %70 = vector.multi_reduction <maximumf>, %69, %cst_14 [2] : vector<4x16x16xf32> to vector<4x16xf32>
    %71 = vector.shape_cast %70 : vector<4x16xf32> to vector<4x16x1xf32>
    %72 = vector.broadcast %71 : vector<4x16x1xf32> to vector<4x16x16xf32>
    %73 = arith.subf %69, %72 : vector<4x16x16xf32>
    %74 = math.exp %73 : vector<4x16x16xf32>
    %cst_15 = arith.constant dense<0.000000e+00> : vector<4x16xf32>
    %75 = vector.multi_reduction <add>, %74, %cst_15 [2] : vector<4x16x16xf32> to vector<4x16xf32>
    %76 = vector.shape_cast %75 : vector<4x16xf32> to vector<4x16x1xf32>
    %77 = tpu.reciprocal %76 {approx = true} : vector<4x16x1xf32> -> vector<4x16x1xf32>
    %78 = vector.broadcast %77 : vector<4x16x1xf32> to vector<4x16x16xf32>
    %79 = arith.mulf %74, %78 : vector<4x16x16xf32>
    %80 = arith.truncf %79 : vector<4x16x16xf32> to vector<4x16x16xbf16>
    "tpu.trace_start"() <{level = 10 : i32, message = "hts,hsd->htd"}> : () -> ()
    %cst_16 = arith.constant dense<0.000000e+00> : vector<4x16x8xf32>
    %81 = tpu.matmul %80, %62, %cst_16 {dimension_numbers = #tpu.dot_dimension_numbers<[2], [1], [1], [2], [0, 0, 0, 1, 1, 2], [0], [0]>} : vector<4x16x16xbf16>, vector<4x16x8xbf16>, vector<4x16x8xf32> -> vector<4x16x8xf32>
    "tpu.trace_stop"() : () -> ()
    %82 = vector.extract_strided_slice %81 {offsets = [0, 0, 0], sizes = [1, 16, 8], strides = [1, 1, 1]} : vector<4x16x8xf32> to vector<1x16x8xf32>
    %83 = vector.shape_cast %82 : vector<1x16x8xf32> to vector<16x8xf32>
    %84 = vector.extract_strided_slice %81 {offsets = [1, 0, 0], sizes = [1, 16, 8], strides = [1, 1, 1]} : vector<4x16x8xf32> to vector<1x16x8xf32>
    %85 = vector.shape_cast %84 : vector<1x16x8xf32> to vector<16x8xf32>
    %86 = vector.extract_strided_slice %81 {offsets = [2, 0, 0], sizes = [1, 16, 8], strides = [1, 1, 1]} : vector<4x16x8xf32> to vector<1x16x8xf32>
    %87 = vector.shape_cast %86 : vector<1x16x8xf32> to vector<16x8xf32>
    %88 = vector.extract_strided_slice %81 {offsets = [3, 0, 0], sizes = [1, 16, 8], strides = [1, 1, 1]} : vector<4x16x8xf32> to vector<1x16x8xf32>
    %89 = vector.shape_cast %88 : vector<1x16x8xf32> to vector<16x8xf32>
    %90 = tpu.concatenate %83, %85, %87, %89 in 1 : vector<16x8xf32>, vector<16x8xf32>, vector<16x8xf32>, vector<16x8xf32> -> vector<16x32xf32>
    %91 = arith.truncf %90 : vector<16x32xf32> to vector<16x32xbf16>
    %c0_17 = arith.constant 0 : index
    %c0_18 = arith.constant 0 : index
    %92 = vector.load %arg2[%c0_17, %c0_18] : memref<32x32xbf16, #tpu.memory_space<vmem>>, vector<32x32xbf16>
    %cst_19 = arith.constant dense<0.000000e+00> : vector<16x32xf32>
    %93 = tpu.matmul %91, %92, %cst_19 {dimension_numbers = #tpu.dot_dimension_numbers<[1], [0], [0], [1], [0, 0, 1, 1], [], []>} : vector<16x32xbf16>, vector<32x32xbf16>, vector<16x32xf32> -> vector<16x32xf32>
    %94 = vector.broadcast %6 : vector<1x32xf32> to vector<16x32xf32>
    %95 = arith.addf %93, %94 : vector<16x32xf32>
    %96 = arith.addf %0, %95 : vector<16x32xf32>
    %cst_20 = arith.constant dense<0.000000e+00> : vector<16xf32>
    %97 = vector.multi_reduction <add>, %96, %cst_20 [1] : vector<16x32xf32> to vector<16xf32>
    %98 = vector.shape_cast %97 : vector<16xf32> to vector<16x1xf32>
    %cst_21 = arith.constant 3.200000e+01 : f32
    %99 = vector.broadcast %cst_21 : f32 to vector<16x1xf32>
    %100 = arith.divf %98, %99 : vector<16x1xf32>
    %101 = vector.broadcast %100 : vector<16x1xf32> to vector<16x32xf32>
    %102 = arith.subf %96, %101 : vector<16x32xf32>
    %103 = arith.mulf %102, %102 : vector<16x32xf32>
    %cst_22 = arith.constant dense<0.000000e+00> : vector<16xf32>
    %104 = vector.multi_reduction <add>, %103, %cst_22 [1] : vector<16x32xf32> to vector<16xf32>
    %105 = vector.shape_cast %104 : vector<16xf32> to vector<16x1xf32>
    %cst_23 = arith.constant 3.200000e+01 : f32
    %106 = vector.broadcast %cst_23 : f32 to vector<16x1xf32>
    %107 = arith.divf %105, %106 : vector<16x1xf32>
    %108 = vector.broadcast %100 : vector<16x1xf32> to vector<16x32xf32>
    %109 = arith.subf %96, %108 : vector<16x32xf32>
    %cst_24 = arith.constant 9.99999974E-6 : f32
    %110 = vector.broadcast %cst_24 : f32 to vector<16x1xf32>
    %111 = arith.addf %107, %110 : vector<16x1xf32>
    %112 = math.rsqrt %111 : vector<16x1xf32>
    %113 = vector.broadcast %112 : vector<16x1xf32> to vector<16x32xf32>
    %114 = arith.mulf %109, %113 : vector<16x32xf32>
    %115 = vector.broadcast %4 : vector<1x32xf32> to vector<16x32xf32>
    %116 = arith.mulf %114, %115 : vector<16x32xf32>
    %117 = vector.broadcast %5 : vector<1x32xf32> to vector<16x32xf32>
    %118 = arith.addf %116, %117 : vector<16x32xf32>
    %119 = arith.truncf %118 : vector<16x32xf32> to vector<16x32xbf16>
    %c0_25 = arith.constant 0 : index
    %c0_26 = arith.constant 0 : index
    %120 = vector.load %arg3[%c0_25, %c0_26] : memref<32x128xbf16, #tpu.memory_space<vmem>>, vector<32x128xbf16>
    %cst_27 = arith.constant dense<0.000000e+00> : vector<16x128xf32>
    %121 = tpu.matmul %119, %120, %cst_27 {dimension_numbers = #tpu.dot_dimension_numbers<[1], [0], [0], [1], [0, 0, 1, 1], [], []>} : vector<16x32xbf16>, vector<32x128xbf16>, vector<16x128xf32> -> vector<16x128xf32>
    %c0_28 = arith.constant 0 : index
    %c0_29 = arith.constant 0 : index
    %122 = vector.load %arg6[%c0_28, %c0_29] : memref<1x128xf32, #tpu.memory_space<vmem>>, vector<1x128xf32>
    %123 = vector.broadcast %122 : vector<1x128xf32> to vector<16x128xf32>
    %124 = arith.addf %121, %123 : vector<16x128xf32>
    %cst_30 = arith.constant 0.000000e+00 : f32
    %125 = vector.broadcast %cst_30 : f32 to vector<16x128xf32>
    %126 = arith.maximumf %124, %125 : vector<16x128xf32>
    %127 = arith.truncf %126 : vector<16x128xf32> to vector<16x128xbf16>
    %c0_31 = arith.constant 0 : index
    %c0_32 = arith.constant 0 : index
    %128 = vector.load %arg4[%c0_31, %c0_32] : memref<128x32xbf16, #tpu.memory_space<vmem>>, vector<128x32xbf16>
    %cst_33 = arith.constant dense<0.000000e+00> : vector<16x32xf32>
    %129 = tpu.matmul %127, %128, %cst_33 {dimension_numbers = #tpu.dot_dimension_numbers<[1], [0], [0], [1], [0, 0, 1, 1], [], []>} : vector<16x128xbf16>, vector<128x32xbf16>, vector<16x32xf32> -> vector<16x32xf32>
    %130 = vector.broadcast %7 : vector<1x32xf32> to vector<16x32xf32>
    %131 = arith.addf %129, %130 : vector<16x32xf32>
    %132 = arith.addf %96, %131 : vector<16x32xf32>
    %c0_34 = arith.constant 0 : index
    %c0_35 = arith.constant 0 : index
    %133 = vector.load %arg8[%c0_34, %c0_35] : memref<16x32xf32, #tpu.memory_space<vmem>>, vector<16x32xf32>
    tpu.vector_store %arg8[%c0_34, %c0_35], %132 {strides = array<i32>} : memref<16x32xf32, #tpu.memory_space<vmem>>, vector<16x32xf32>,
    return
  }
}

</mosaic_0001>

<bundles_post_ra>
// kernel: tpu_custom_call.1
= control target key start
LH: loop header
LB: loop body
LE: loop exit
PB: predicated region body
PF: predicated region fallthrough
CT: control target
= control target key end

     0   :  { %vm34_vm0 = vcmask 261120   ;;  %s1549_s0 = inlined_call_operand.vmem [shape: f32[16,32], index: 0, kind: input, shape index: {}]   ;;  %s1550_s1 = inlined_call_operand.vmem [shape: bf16[32,96], index: 1, kind: input, shape index: {}]   ;;  %s1551_s2 = inlined_call_operand.vmem [shape: bf16[32,32], index: 2, kind: input, shape index: {}]   ;;  %s1552_s3 = inlined_call_operand.vmem [shape: bf16[32,128], index: 3, kind: input, shape index: {}]   ;;  %s1553_s4 = inlined_call_operand.vmem [shape: bf16[128,32], index: 4, kind: input, shape index: {}]   ;;  %s1554_s5 = inlined_call_operand.vmem [shape: f32[6,32], index: 5, kind: input, shape index: {}]   ;;  %s1555_s6 = inlined_call_operand.vmem [shape: f32[1,128], index: 6, kind: input, shape index: {}]   ;;  %s1556_s7 = inlined_call_operand.vmem [shape: f32[16,16], index: 7, kind: input, shape index: {}]   ;;  %s1557_s8 = inlined_call_operand.hbm [shape: f32[16,32], index: 8, kind: output, shape index: {}]  }
   0x1   :  { %v1327_v0 = vld [vmem:[%s1549_s0] sm:$0xff]  ;;  %v1332_v1 = vld [vmem:[%s1549_s0 + $0x8] sm:$0xff] }
   0x2   :  { %v35_v2 = vsel %vm34_vm0, %v1327_v0, 0.0  ;;  %v38_v3 = vsel %vm34_vm0, %v1332_v1, 0.0 }
   0x3   :  { %36 = vadd.xlane.f32.xlu0 %v35_v2 }
   0x7   :  { %39 = vadd.xlane.f32.xlu0 %v38_v3 }
   0x8   :  { %13 = vsyncpa [#allocation3], 0  ;;  %v1189_v14 = vld [vmem:[%s1550_s1] sm:$0xff]   ;;  %v1267_v15 = vmov 0.0   ;;  %v1190_v16 = vld [vmem:[%s1550_s1 + $0x8] sm:$0xff]   ;;  %vm1268_vm1 = vmmov 0   ;;  %v62_v21 = vlaneseq }
   0x9   :  { %1055 = vmatprep.subr.bf16.mxu0 %v1267_v15  ;;  %1075 = vmatprep.subr.bf16.mxu1 %v1267_v15  ;;  %v1362_v26 = vld [vmem:[%s1554_s5] sm:$0x3f]  ;;  %s1269_s5 = smov 112   ;;  %s1270_s13 = smov 120   ;;  %vm162_vm2 = vcmask 64512   ;;  %vm378_vm3 = vcmask 130048  }
   0xa   :  { %1056 = vmatpush3.bf16.msra.mxu0 %v1189_v14  ;;  %1059 = vmatprep.mubr.msk.bf16.mxu0 %vm1268_vm1, %v1267_v15  ;;  %v1356_v24 = vshrl.u32 %v62_v21, 7  ;;  %s1271_s14 = smov 104   ;;  %s1272_s15 = smov 96   ;;  %vm687_vm4 = vcmask 195584  }
   0xb   :  { %1057 = vmatprep.subr.bf16.mxu0 %v1267_v15  ;;  %1077 = vmatprep.mubr.msk.bf16.mxu1 %vm1268_vm1, %v1267_v15  ;;  %s1274_s24 = smov 8   ;;  %s1275_s25 = smov 16  }
   0xc   :  { %v64_v25 = vsub.s32 0, %v1356_v24  ;;  %v70_v30 = vsub.s32 1, %v1356_v24 }
   0xe   :  { %1058 = vmatpush3.bf16.msra.mxu0 %v1190_v16  ;;  %v65_v29 = vrot.slane %v1362_v26, %v64_v25  ;;  %v71_v34 = vrot.slane %v1362_v26, %v70_v30 }
   0xf   :  { %1063 = vmatprep.subr.bf16.mxu0 %v1267_v15 }
  0x90   :  { %v37_v4 = vpop.xlane.xlu0 %36 }
  0x91   :  { %v42_v5 = vmul.f32 0.03125, %v37_v4  ;;  %v368_v4 = vld [vmem:[%s1556_s7] sm:$0xff] }
  0x93   :  { %v44_v6 = vsub.f32 %v1327_v0, %v42_v5 }
  0x94   :  { %v40_v7 = vpop.xlane.xlu0 %39 }
  0x95   :  { %v43_v8 = vmul.f32 0.03125, %v40_v7  ;;  %v46_v9 = vmul.f32 %v44_v6, %v44_v6 }
  0x97   :  { %v45_v10 = vsub.f32 %v1332_v1, %v43_v8  ;;  %v48_v11 = vsel %vm34_vm0, %v46_v9, 0.0  ;;  %v369_v8 = vld [vmem:[%s1556_s7 + $0x8] sm:$0xff]  ;;  %s1273_s7 = smov 64  }
  0x98   :  { %49 = vadd.xlane.f32.xlu1 %v48_v11 }
  0x99   :  { %v47_v12 = vmul.f32 %v45_v10, %v45_v10 }
  0x9b   :  { %v51_v13 = vsel %vm34_vm0, %v47_v12, 0.0 }
  0x9c   :  { %52 = vadd.xlane.f32.xlu1 %v51_v13 }
 0x125   :  { %v50_v17 = vpop.xlane.xlu1 %49 }
 0x126   :  { %v54_v18 = vmul.f32 0.03125, %v50_v17 }
 0x128   :  { %v56_v19 = vadd.f32 1e-05, %v54_v18 }
 0x129   :  { %v53_v20 = vpop.xlane.xlu1 %52 }
 0x12a   :  { %1203 = vrsqrt.f32 %v56_v19  ;;  %v55_v22 = vmul.f32 0.03125, %v53_v20 }
 0x12c   :  { %v57_v23 = vadd.f32 1e-05, %v55_v22 }
 0x12e   :  { %1205 = vrsqrt.f32 %v57_v23 }
 0x134   :  { %v1204_v27 = vpop.eup %1203 }
 0x135   :  { %v60_v28 = vmul.f32 %v1204_v27, %v44_v6 }
 0x137   :  { %v66_v33 = vmul.f32 %v65_v29, %v60_v28 }
 0x138   :  { %v1206_v31 = vpop.eup %1205 }
 0x139   :  { %v61_v32 = vmul.f32 %v1206_v31, %v45_v10  ;;  %v72_v36 = vadd.f32 %v71_v34, %v66_v33 }
 0x13b   :  { %v67_v35 = vmul.f32 %v65_v29, %v61_v32 }
 0x13d   :  { %v73_v37 = vadd.f32 %v71_v34, %v67_v35 }
 0x13f   :  { %v74_v38 = vpack.c.bf16 %v73_v37, %v72_v36 }
 0x141   :  { %1060 = vmatmul.mubr.msk.bf16.vlgmr.msra.gmra.mrb[0].mxu0 %vm34_vm0, %v74_v38 }
 0x142   :  { %1065 = vmatprep.mubr.msk.bf16.mxu0 %vm1268_vm1, %v1267_v15 }
 0x214   :  { %v128_v39 = vpop.f32.mrb[0].mxu0 }
 0x215   :  { %v1061_v40 = vpop.f32.mrb[1].mxu0 }
 0x216   :  { %v131_v41 = vpop.f32.mrb[2].mxu0 }
 0x217   :  { %v1062_v42 = vpop.f32.mrb[3].mxu0  ;;  %v1164_v43 = vpack.i.bf16 %v131_v41, %v128_v39  ;;  %v1370_v44 = vpack.c.bf16 %v131_v41, %v128_v39 }
 0x219   :  { %1165 = vrot.lane.b32.xlu1 %v1164_v43, %s1269_s5  ;;  %1160 = vrot.lane.b32.xlu0 %v1164_v43, %s1270_s13 }
 0x21d   :  { %1170 = vrot.lane.b32.xlu1 %v1164_v43, %s1271_s14 }
 0x221   :  { %160 = vrot.lane.b32.xlu1 %v1370_v44, %s1272_s15 }
 0x28b   :  { %v1166_v45 = vpop.permute.xlu1 %1165  ;;  %v1161_v46 = vpop.permute.xlu0 %1160 }
 0x28c   :  { %v1168_v47 = vunpack.i.h.bf16 %v1166_v45  ;;  %v1167_v48 = vunpack.i.l.bf16 %v1166_v45  ;;  %v1163_v49 = vunpack.i.h.bf16 %v1161_v46  ;;  %v1162_v50 = vunpack.i.l.bf16 %v1161_v46 }
 0x28e   :  { %v1373_v51 = vpack.c.bf16 %v1168_v47, %v1167_v48  ;;  %v1375_v52 = vpack.c.bf16 %v1163_v49, %v1162_v50 }
 0x28f   :  { %v1171_v53 = vpop.permute.xlu1 %1170 }
 0x290   :  { %v1173_v54 = vunpack.i.h.bf16 %v1171_v53  ;;  %v1172_v55 = vunpack.i.l.bf16 %v1171_v53  ;;  %211 = vrot.lane.b32.xlu0 %v1375_v52, %s1272_s15  ;;  %261 = vrot.lane.b32.xlu1 %v1373_v51, %s1272_s15 }
 0x292   :  { %v1379_v56 = vpack.c.bf16 %v1173_v54, %v1172_v55 }
 0x293   :  { %v161_v57 = vpop.permute.xlu1 %160 }
 0x294   :  { %v167_v58 = vsel %vm162_vm2, %v161_v57, 0  ;;  %311 = vrot.lane.b32.xlu0 %v1379_v56, %s1272_s15 }
 0x295   :  { %1064 = vmatpush3.bf16.xpose.msra.mxu0 %v167_v58 }
 0x296   :  { %1069 = vmatprep.subr.bf16.mxu0 %v1267_v15 }
 0x29c   :  { %1066 = vmatmul.mubr.msk.bf16.vlgmr.msra.gmra.mrb[4].mxu0 %vm162_vm2, %v1370_v44 }
 0x29d   :  { %1071 = vmatprep.mubr.msk.bf16.mxu0 %vm1268_vm1, %v1267_v15 }
 0x302   :  { %v212_v59 = vpop.permute.xlu0 %211  ;;  %v262_v60 = vpop.permute.xlu1 %261 }
 0x303   :  { %v217_v61 = vsel %vm162_vm2, %v212_v59, 0  ;;  %v267_v62 = vsel %vm162_vm2, %v262_v60, 0 }
 0x304   :  { %1070 = vmatpush3.bf16.xpose.msra.mxu0 %v217_v61  ;;  %1076 = vmatpush3.bf16.xpose.msra.mxu1 %v267_v62 }
 0x305   :  { %1081 = vmatprep.subr.bf16.mxu0 %v1267_v15  ;;  %1087 = vmatprep.subr.bf16.mxu1 %v1267_v15 }
 0x306   :  { %v312_v63 = vpop.permute.xlu0 %311 }
 0x307   :  { %v317_v2 = vsel %vm162_vm2, %v312_v63, 0 }
 0x30b   :  { %1072 = vmatmul.mubr.msk.bf16.vlgmr.msra.gmra.mrb[8].mxu0 %vm162_vm2, %v1375_v52  ;;  %1078 = vmatmul.mubr.msk.bf16.vlgmr.msra.gmra.mrb[0].mxu1 %vm162_vm2, %v1373_v51 }
 0x30c   :  { %1082 = vmatpush3.bf16.xpose.msra.mxu0 %v317_v2  ;;  %1083 = vmatprep.mubr.msk.bf16.mxu0 %vm1268_vm1, %v1267_v15 }
 0x30d   :  { %1089 = vmatprep.mubr.msk.bf16.mxu1 %vm1268_vm1, %v1267_v15  ;;  %1093 = vmatprep.subr.bf16.mxu0 %v1267_v15 }
 0x313   :  { %1084 = vmatmul.mubr.msk.bf16.vlgmr.msra.gmra.mrb[12].mxu0 %vm162_vm2, %v1379_v56 }
 0x314   :  { %1095 = vmatprep.mubr.msk.bf16.mxu0 %vm1268_vm1, %v1267_v15 }
 0x36f   :  { %v203_v3 = vpop.f32.mrb[4].mxu0 }
 0x370   :  { %v360_v5 = vmul.f32 0.17677669, %v203_v3  ;;  %v1067_v6 = vpop.f32.mrb[5].mxu0 }
 0x371   :  { %v206_v7 = vpop.f32.mrb[6].mxu0 }
 0x372   :  { %v361_v9 = vmul.f32 0.17677669, %v206_v7  ;;  %v1068_v10 = vpop.f32.mrb[7].mxu0  ;;  %v370_v11 = vadd.f32 %v368_v4, %v360_v5 }
 0x374   :  { %v379_v12 = vsel %vm378_vm3, %v370_v11, -inf  ;;  %v371_v13 = vadd.f32 %v369_v8, %v361_v9 }
 0x375   :  { %380 = vmax.xlane.f32.xlu1 %v379_v12 }
 0x376   :  { %v382_v14 = vsel %vm378_vm3, %v371_v13, -inf }
 0x377   :  { %383 = vmax.xlane.f32.xlu0 %v382_v14 }
 0x3de   :  { %v253_v16 = vpop.f32.mrb[8].mxu0  ;;  %v303_v17 = vpop.f32.mrb[0].mxu1 }
 0x3df   :  { %v362_v18 = vmul.f32 0.17677669, %v253_v16  ;;  %v364_v19 = vmul.f32 0.17677669, %v303_v17  ;;  %v1073_v20 = vpop.f32.mrb[9].mxu0  ;;  %v1079_v21 = vpop.f32.mrb[1].mxu1 }
 0x3e0   :  { %v256_v22 = vpop.f32.mrb[10].mxu0  ;;  %v306_v23 = vpop.f32.mrb[2].mxu1 }
 0x3e1   :  { %v363_v25 = vmul.f32 0.17677669, %v256_v22  ;;  %v1074_v27 = vpop.f32.mrb[11].mxu0  ;;  %v1080_v28 = vpop.f32.mrb[3].mxu1  ;;  %v374_v29 = vadd.f32 %v368_v4, %v364_v19  ;;  %v372_v30 = vadd.f32 %v368_v4, %v362_v18  ;;  %v365_v31 = vmul.f32 0.17677669, %v306_v23 }
 0x3e3   :  { %v391_v32 = vsel %vm378_vm3, %v374_v29, -inf  ;;  %v385_v33 = vsel %vm378_vm3, %v372_v30, -inf  ;;  %v373_v34 = vadd.f32 %v369_v8, %v363_v25  ;;  %v375_v39 = vadd.f32 %v369_v8, %v365_v31 }
 0x3e4   :  { %392 = vmax.xlane.f32.xlu1 %v391_v32  ;;  %386 = vmax.xlane.f32.xlu0 %v385_v33 }
 0x3e5   :  { %v388_v38 = vsel %vm378_vm3, %v373_v34, -inf  ;;  %v394_v45 = vsel %vm378_vm3, %v375_v39, -inf }
 0x3e6   :  { %v353_v35 = vpop.f32.mrb[12].mxu0 }
 0x3e7   :  { %v366_v36 = vmul.f32 0.17677669, %v353_v35  ;;  %v1085_v37 = vpop.f32.mrb[13].mxu0 }
 0x3e8   :  { %389 = vmax.xlane.f32.xlu0 %v388_v38  ;;  %v356_v40 = vpop.f32.mrb[14].mxu0 }
 0x3e9   :  { %v367_v41 = vmul.f32 0.17677669, %v356_v40  ;;  %v1086_v42 = vpop.f32.mrb[15].mxu0  ;;  %v376_v43 = vadd.f32 %v368_v4, %v366_v36 }
 0x3eb   :  { %v397_v46 = vsel %vm378_vm3, %v376_v43, -inf  ;;  %v377_v47 = vadd.f32 %v369_v8, %v367_v41 }
 0x3ec   :  { %395 = vmax.xlane.f32.xlu0 %v394_v45  ;;  %398 = vmax.xlane.f32.xlu1 %v397_v46 }
 0x3ed   :  { %v400_v48 = vsel %vm378_vm3, %v377_v47, -inf }
 0x3f0   :  { %401 = vmax.xlane.f32.xlu0 %v400_v48 }
 0x3fd   :  { %471 = vrot.lane.b32.xlu1 %v1370_v44, %s1273_s7 }
 0x402   :  { %v381_v54 = vpop.xlane.xlu1 %380 }
 0x403   :  { %v403_v55 = vsub.f32 %v370_v11, %v381_v54 }
 0x404   :  { %v384_v49 = vpop.xlane.xlu0 %383 }
 0x405   :  { %v404_v50 = vsub.f32 %v371_v13, %v384_v49  ;;  %v411_v57 = vmul.f32 1.442695, %v403_v55 }
 0x407   :  { %v413_v53 = vmul.f32 1.442695, %v404_v50 }
 0x409   :  { %1207 = vpow2.f32 %v413_v53 }
 0x40a   :  { %1209 = vpow2.f32 %v411_v57 }
 0x413   :  { %v1208_v58 = vpop.eup %1207 }
 0x414   :  { %v430_v59 = vsel %vm378_vm3, %v1208_v58, 0.0  ;;  %v1210_v60 = vpop.eup %1209 }
 0x415   :  { %431 = vadd.xlane.f32.xlu0 %v430_v59  ;;  %v427_v61 = vsel %vm378_vm3, %v1210_v60, 0.0 }
 0x421   :  { %428 = vadd.xlane.f32.xlu1 %v427_v61 }
 0x471   :  { %v393_v62 = vpop.xlane.xlu1 %392  ;;  %v387_v63 = vpop.xlane.xlu0 %386 }
 0x472   :  { %v407_v2 = vsub.f32 %v374_v29, %v393_v62  ;;  %v405_v44 = vsub.f32 %v372_v30, %v387_v63 }
 0x474   :  { %v415_v3 = vmul.f32 1.442695, %v405_v44  ;;  %v419_v4 = vmul.f32 1.442695, %v407_v2 }
 0x475   :  { %v390_v5 = vpop.xlane.xlu0 %389 }
 0x476   :  { %v406_v6 = vsub.f32 %v373_v34, %v390_v5  ;;  %1211 = vpow2.f32 %v415_v3 }
 0x477   :  { %1213 = vpow2.f32 %v419_v4 }
 0x478   :  { %v417_v7 = vmul.f32 1.442695, %v406_v6  ;;  %v1191_v6 = vld [vmem:[%s1551_s2] sm:$0xff]  }
 0x479   :  { %v396_v8 = vpop.xlane.xlu0 %395  ;;  %v399_v9 = vpop.xlane.xlu1 %398 }
 0x47a   :  { %1215 = vpow2.f32 %v417_v7  ;;  %v408_v10 = vsub.f32 %v375_v39, %v396_v8  ;;  %v409_v11 = vsub.f32 %v376_v43, %v399_v9  ;;  %v1192_v9 = vld [vmem:[%s1551_s2 + $0x8] sm:$0xff]   ;;  %s1276_s2 = smov 24  }
 0x47c   :  { %v421_v12 = vmul.f32 1.442695, %v408_v10  ;;  %v423_v13 = vmul.f32 1.442695, %v409_v11 }
 0x47d   :  { %v472_v14 = vpop.permute.xlu1 %471  ;;  %v402_v16 = vpop.xlane.xlu0 %401 }
 0x47e   :  { %1217 = vpow2.f32 %v421_v12  ;;  %v410_v17 = vsub.f32 %v377_v47, %v402_v16  ;;  %1088 = vmatpush3.bf16.msra.mxu1 %v472_v14 }
 0x47f   :  { %1219 = vpow2.f32 %v423_v13  ;;  %1099 = vmatprep.subr.bf16.mxu1 %v1267_v15 }
 0x480   :  { %v425_v18 = vmul.f32 1.442695, %v410_v17  ;;  %v1212_v19 = vpop.eup %1211 }
 0x481   :  { %v433_v20 = vsel %vm378_vm3, %v1212_v19, 0.0  ;;  %v1214_v21 = vpop.eup %1213 }
 0x482   :  { %1221 = vpow2.f32 %v425_v18  ;;  %434 = vadd.xlane.f32.xlu1 %v433_v20  ;;  %v439_v25 = vsel %vm378_vm3, %v1214_v21, 0.0 }
 0x484   :  { %v1216_v22 = vpop.eup %1215 }
 0x485   :  { %v436_v23 = vsel %vm378_vm3, %v1216_v22, 0.0 }
 0x486   :  { %437 = vadd.xlane.f32.xlu0 %v436_v23  ;;  %440 = vadd.xlane.f32.xlu1 %v439_v25 }
 0x488   :  { %v1218_v27 = vpop.eup %1217 }
 0x489   :  { %v1220_v28 = vpop.eup %1219  ;;  %v442_v29 = vsel %vm378_vm3, %v1218_v27, 0.0 }
 0x48a   :  { %v445_v30 = vsel %vm378_vm3, %v1220_v28, 0.0  ;;  %443 = vadd.xlane.f32.xlu0 %v442_v29 }
 0x48b   :  { %446 = vadd.xlane.f32.xlu1 %v445_v30 }
 0x48c   :  { %v1222_v31 = vpop.eup %1221 }
 0x48d   :  { %v448_v32 = vsel %vm378_vm3, %v1222_v31, 0.0 }
 0x48e   :  { %449 = vadd.xlane.f32.xlu0 %v448_v32 }
 0x49c   :  { %565 = vrot.lane.b32.xlu1 %v1373_v51, %s1273_s7 }
 0x4a0   :  { %612 = vrot.lane.b32.xlu1 %v1379_v56, %s1273_s7 }
 0x4a2   :  { %v432_v33 = vpop.xlane.xlu0 %431 }
 0x4a3   :  { %1223 = vrcp.f32 %v432_v33 }
 0x4a4   :  { %518 = vrot.lane.b32.xlu0 %v1375_v52, %s1273_s7 }
 0x4ad   :  { %v1224_v35 = vpop.eup %1223 }
 0x4ae   :  { %v429_v34 = vpop.xlane.xlu1 %428  ;;  %v460_v37 = vmul.f32 %v1224_v35, %v1208_v58 }
 0x4af   :  { %1225 = vrcp.f32 %v429_v34 }
 0x4b9   :  { %v1226_v36 = vpop.eup %1225 }
 0x4ba   :  { %v459_v38 = vmul.f32 %v1226_v36, %v1210_v60 }
 0x4bc   :  { %v467_v39 = vpack.c.bf16 %v460_v37, %v459_v38 }
 0x4be   :  { %1090 = vmatmul.mubr.msk.bf16.vlgmr.msra.gmra.mrb[4].mxu1 %vm378_vm3, %v467_v39 }
 0x4bf   :  { %1101 = vmatprep.mubr.msk.bf16.mxu1 %vm1268_vm1, %v1267_v15 }
 0x50f   :  { %v435_v51 = vpop.xlane.xlu1 %434 }
 0x510   :  { %1227 = vrcp.f32 %v435_v51 }
 0x513   :  { %v438_v56 = vpop.xlane.xlu0 %437  ;;  %v441_v40 = vpop.xlane.xlu1 %440 }
 0x514   :  { %1229 = vrcp.f32 %v438_v56 }
 0x515   :  { %1231 = vrcp.f32 %v441_v40  ;;  %v697_v40 = vsub.s32 4, %v1356_v24 }
 0x517   :  { %v444_v52 = vpop.xlane.xlu0 %443 }
 0x518   :  { %v447_v41 = vpop.xlane.xlu1 %446  ;;  %1233 = vrcp.f32 %v444_v52  ;;  %v698_v52 = vrot.slane %v1362_v26, %v697_v40 }
 0x519   :  { %1235 = vrcp.f32 %v447_v41 }
 0x51a   :  { %v1228_v43 = vpop.eup %1227 }
 0x51b   :  { %v450_v42 = vpop.xlane.xlu0 %449  ;;  %v461_v47 = vmul.f32 %v1228_v43, %v1212_v19 }
 0x51c   :  { %v566_v45 = vpop.permute.xlu1 %565  ;;  %1237 = vrcp.f32 %v450_v42 }
 0x51d   :  { %1100 = vmatpush3.bf16.msra.mxu1 %v566_v45 }
 0x51e   :  { %v1230_v46 = vpop.eup %1229  ;;  %1111 = vmatprep.subr.bf16.mxu1 %v1267_v15 }
 0x51f   :  { %v462_v48 = vmul.f32 %v1230_v46, %v1216_v22  ;;  %v519_v49 = vpop.permute.xlu0 %518  ;;  %v1232_v50 = vpop.eup %1231 }
 0x520   :  { %1094 = vmatpush3.bf16.msra.mxu0 %v519_v49  ;;  %v463_v55 = vmul.f32 %v1232_v50, %v1214_v21  ;;  %v613_v58 = vpop.permute.xlu1 %612 }
 0x521   :  { %v468_v53 = vpack.c.bf16 %v462_v48, %v461_v47  ;;  %1105 = vmatprep.subr.bf16.mxu0 %v1267_v15 }
 0x522   :  { %v1234_v54 = vpop.eup %1233 }
 0x523   :  { %v464_v57 = vmul.f32 %v1234_v54, %v1218_v27  ;;  %1096 = vmatmul.mubr.msk.bf16.vlgmr.msra.gmra.mrb[16].mxu0 %vm378_vm3, %v468_v53  ;;  %v1236_v59 = vpop.eup %1235 }
 0x524   :  { %1106 = vmatpush3.bf16.msra.mxu0 %v613_v58  ;;  %1107 = vmatprep.mubr.msk.bf16.mxu0 %vm1268_vm1, %v1267_v15  ;;  %v465_v62 = vmul.f32 %v1236_v59, %v1220_v28 }
 0x525   :  { %v469_v60 = vpack.c.bf16 %v464_v57, %v463_v55  ;;  %1119 = vmatprep.subr.bf16.mxu0 %v1267_v15 }
 0x526   :  { %v1238_v61 = vpop.eup %1237 }
 0x527   :  { %v466_v63 = vmul.f32 %v1238_v61, %v1222_v31  ;;  %1102 = vmatmul.mubr.msk.bf16.vlgmr.msra.gmra.mrb[8].mxu1 %vm378_vm3, %v469_v60 }
 0x528   :  { %1115 = vmatprep.mubr.msk.bf16.mxu1 %vm1268_vm1, %v1267_v15  ;;  %1112 = vmatpush3.bf16.msra.mxu1 %v1191_v6  ;;  %v1199_v6 = vld [vmem:[%s1553_s4 + $0x20] sm:$0xff]  }
 0x529   :  { %v470_v2 = vpack.c.bf16 %v466_v63, %v465_v62  ;;  %1113 = vmatprep.subr.bf16.mxu1 %v1267_v15  ;;  %v1193_v63 = vld [vmem:[%s1552_s3] sm:$0xff]  }
 0x52b   :  { %1108 = vmatmul.mubr.msk.bf16.vlgmr.msra.gmra.mrb[20].mxu0 %vm378_vm3, %v470_v2  ;;  %v1194_v2 = vld [vmem:[%s1552_s3 + $0x8] sm:$0xff]  }
 0x52c   :  { %1123 = vmatprep.mubr.msk.bf16.mxu0 %vm1268_vm1, %v1267_v15  ;;  %1114 = vmatpush3.bf16.msra.mxu1 %v1192_v9 }
 0x52d   :  { %1127 = vmatprep.subr.bf16.mxu1 %v1267_v15  ;;  %1120 = vmatpush3.bf16.msra.mxu0 %v1193_v63 }
 0x52e   :  { %1121 = vmatprep.subr.bf16.mxu0 %v1267_v15 }
 0x531   :  { %1122 = vmatpush3.bf16.msra.mxu0 %v1194_v2 }
 0x591   :  { %v511_v44 = vpop.f32.mrb[4].mxu1 }
 0x592   :  { %v1091_v3 = vpop.f32.mrb[5].mxu1 }
 0x593   :  { %v514_v4 = vpop.f32.mrb[6].mxu1  ;;  %v1196_v3 = vld [vmem:[%s1553_s4 + $0x8] sm:$0xff]  }
 0x594   :  { %v1092_v5 = vpop.f32.mrb[7].mxu1 }
 0x595   :  { %v1198_v5 = vld [vmem:[%s1553_s4 + $0x18] sm:$0xff]  }
 0x5f6   :  { %v558_v7 = vpop.f32.mrb[16].mxu0 }
 0x5f7   :  { %v1097_v8 = vpop.f32.mrb[17].mxu0 }
 0x5f8   :  { %v561_v10 = vpop.f32.mrb[18].mxu0 }
 0x5f9   :  { %v1174_v11 = vpack.i.bf16 %v561_v10, %v558_v7  ;;  %v1098_v12 = vpop.f32.mrb[19].mxu0  ;;  %v1200_v7 = vld [vmem:[%s1553_s4 + $0x28] sm:$0xff]  }
 0x5fa   :  { %v605_v13 = vpop.f32.mrb[8].mxu1 }
 0x5fb   :  { %v1103_v14 = vpop.f32.mrb[9].mxu1  ;;  %1175 = vrot.lane.b32.xlu1 %v1174_v11, %s1274_s24 }
 0x5fc   :  { %v608_v16 = vpop.f32.mrb[10].mxu1  ;;  %v785_v14 = vsub.s32 2, %v1356_v24 }
 0x5fd   :  { %v1179_v17 = vpack.i.bf16 %v608_v16, %v605_v13  ;;  %v1104_v18 = vpop.f32.mrb[11].mxu1 }
 0x5fe   :  { %v652_v19 = vpop.f32.mrb[20].mxu0 }
 0x5ff   :  { %1180 = vrot.lane.b32.xlu0 %v1179_v17, %s1275_s25  ;;  %v1109_v20 = vpop.f32.mrb[21].mxu0  ;;  %v786_v17 = vrot.slane %v1362_v26, %v785_v14 }
 0x600   :  { %v655_v21 = vpop.f32.mrb[22].mxu0 }
 0x601   :  { %v1184_v22 = vpack.i.bf16 %v655_v21, %v652_v19  ;;  %v1110_v23 = vpop.f32.mrb[23].mxu0  ;;  %v791_v19 = vsub.s32 3, %v1356_v24 }
 0x603   :  { %1185 = vrot.lane.b32.xlu1 %v1184_v22, %s1276_s2  ;;  %v792_v23 = vrot.slane %v1362_v26, %v791_v19 }
 0x66d   :  { %v1176_v25 = vpop.permute.xlu1 %1175 }
 0x66e   :  { %v1178_v28 = vunpack.i.h.bf16 %v1176_v25  ;;  %v1177_v29 = vunpack.i.l.bf16 %v1176_v25 }
 0x670   :  { %v684_v33 = vsel %vm162_vm2, %v514_v4, %v1178_v28  ;;  %v683_v34 = vsel %vm162_vm2, %v511_v44, %v1177_v29  ;;  %v1195_v44 = vld [vmem:[%s1553_s4] sm:$0xff]   ;;  %v1197_v4 = vld [vmem:[%s1553_s4 + $0x10] sm:$0xff]  }
 0x671   :  { %v1181_v27 = vpop.permute.xlu0 %1180 }
 0x672   :  { %v1183_v30 = vunpack.i.h.bf16 %v1181_v27  ;;  %v1182_v31 = vunpack.i.l.bf16 %v1181_v27 }
 0x674   :  { %v685_v37 = vsel %vm378_vm3, %v683_v34, %v1182_v31  ;;  %v686_v38 = vsel %vm378_vm3, %v684_v33, %v1183_v30  ;;  %v1201_v30 = vld [vmem:[%s1553_s4 + $0x30] sm:$0xff]   ;;  %v1202_v31 = vld [vmem:[%s1553_s4 + $0x38] sm:$0xff]   ;;  %s1277_s4 = smov [#allocation2]  }
 0x675   :  { %v1186_v32 = vpop.permute.xlu1 %1185 }
 0x676   :  { %v1188_v35 = vunpack.i.h.bf16 %v1186_v32  ;;  %v1187_v36 = vunpack.i.l.bf16 %v1186_v32  ;;  %v1009_v32 = vld [vmem:[%s1555_s6] ss:$0 sm:$0xff]  ;;  %s984_s6 = sshll.u32 %s1277_s4, 4  ;;  %s985_s6 = int_to_ptr.vmem [resolvable:$true] %s984_s6 }
 0x677   :  { %s1243_s21 = scalar_lea.vmem %s985_s6, 256  ;;  %p1248_p1 = scmp.lt.s32.totalorder %s985_s6, %s985_s6 }
 0x678   :  { %v689_v39 = vsel %vm687_vm4, %v686_v38, %v1188_v35  ;;  %v688_v51 = vsel %vm687_vm4, %v685_v37, %v1187_v36  ;;  %p1244_p0 = scmp.ne.s32.totalorder %s985_s6, %s1243_s21  ;;  %p1249_p2 = scmp.lt.s32.totalorder %s1243_s21, %s1243_s21 }
 0x679   :  { %v690_v56 = vpack.c.bf16 %v689_v39, %v688_v51 }
 0x67a   :  { %p1250_p3 = por %p1249_p2, %p1248_p1 }
 0x67b   :  { %1116 = vmatmul.mubr.msk.bf16.vlgmr.msra.gmra.mrb[12].mxu1 %vm34_vm0, %v690_v56 }
 0x67c   :  { %1143 = vmatprep.mubr.msk.bf16.mxu1 %vm1268_vm1, %v1267_v15  ;;  %1128 = vmatpush3.bf16.msra.mxu1 %v1195_v44  ;;  %p1251_p4 = pnand %p1250_p3, %p1244_p0 }
 0x67d   :  { %1129 = vmatprep.subr.bf16.mxu1 %v1267_v15 }
 0x680   :  { %1130 = vmatpush3.bf16.msra.mxu1 %v1196_v3 }
 0x681   :  { %1131 = vmatprep.subr.bf16.mxu1 %v1267_v15 }
 0x684   :  { %1132 = vmatpush3.bf16.msra.mxu1 %v1197_v4 }
 0x685   :  { %1133 = vmatprep.subr.bf16.mxu1 %v1267_v15 }
 0x688   :  { %1134 = vmatpush3.bf16.msra.mxu1 %v1198_v5 }
 0x689   :  { %1135 = vmatprep.subr.bf16.mxu1 %v1267_v15 }
 0x68c   :  { %1136 = vmatpush3.bf16.msra.mxu1 %v1199_v6 }
 0x68d   :  { %1137 = vmatprep.subr.bf16.mxu1 %v1267_v15 }
 0x690   :  { %1138 = vmatpush3.bf16.msra.mxu1 %v1200_v7 }
 0x691   :  { %1139 = vmatprep.subr.bf16.mxu1 %v1267_v15 }
 0x694   :  { %1140 = vmatpush3.bf16.msra.mxu1 %v1201_v30 }
 0x695   :  { %1141 = vmatprep.subr.bf16.mxu1 %v1267_v15  ;;  %v884_v15 = vsub.s32 5, %v1356_v24 }
 0x697   :  { %v885_v40 = vrot.slane %v1362_v26, %v884_v15 }
 0x698   :  { %1142 = vmatpush3.bf16.msra.mxu1 %v1202_v31 }
 0x74e   :  { %v748_v41 = vpop.f32.mrb[12].mxu1 }
 0x74f   :  { %v749_v42 = vadd.f32 %v748_v41, %v698_v52  ;;  %v1117_v43 = vpop.f32.mrb[13].mxu1 }
 0x750   :  { %v751_v45 = vpop.f32.mrb[14].mxu1 }
 0x751   :  { %v1471_v46 = vadd.f32 %v749_v42, %v1327_v0  ;;  %v752_v47 = vadd.f32 %v751_v45, %v698_v52  ;;  %v1118_v48 = vpop.f32.mrb[15].mxu1 }
 0x753   :  { %v1474_v49 = vadd.f32 %v752_v47, %v1332_v1  ;;  %v757_v50 = vsel %vm34_vm0, %v1471_v46, 0.0 }
 0x754   :  { %758 = vadd.xlane.f32.xlu0 %v757_v50 }
 0x755   :  { %v760_v53 = vsel %vm34_vm0, %v1474_v49, 0.0 }
 0x756   :  { %761 = vadd.xlane.f32.xlu1 %v760_v53 }
 0x7e1   :  { %v759_v54 = vpop.xlane.xlu0 %758 }
 0x7e2   :  { %v763_v55 = vmul.f32 0.03125, %v759_v54 }
 0x7e3   :  { %v762_v57 = vpop.xlane.xlu1 %761 }
 0x7e4   :  { %v765_v58 = vsub.f32 %v1471_v46, %v763_v55  ;;  %v764_v0 = vmul.f32 0.03125, %v762_v57 }
 0x7e6   :  { %v766_v59 = vsub.f32 %v1474_v49, %v764_v0  ;;  %v767_v60 = vmul.f32 %v765_v58, %v765_v58 }
 0x7e8   :  { %v769_v1 = vsel %vm34_vm0, %v767_v60, 0.0  ;;  %v768_v61 = vmul.f32 %v766_v59, %v766_v59 }
 0x7e9   :  { %770 = vadd.xlane.f32.xlu0 %v769_v1 }
 0x7ea   :  { %v772_v62 = vsel %vm34_vm0, %v768_v61, 0.0 }
 0x7ed   :  { %773 = vadd.xlane.f32.xlu0 %v772_v62 }
 0x876   :  { %v771_v8 = vpop.xlane.xlu0 %770 }
 0x877   :  { %v775_v9 = vmul.f32 0.03125, %v771_v8 }
 0x879   :  { %v777_v10 = vadd.f32 1e-05, %v775_v9 }
 0x87a   :  { %v774_v11 = vpop.xlane.xlu0 %773 }
 0x87b   :  { %1239 = vrsqrt.f32 %v777_v10  ;;  %v776_v12 = vmul.f32 0.03125, %v774_v11 }
 0x87d   :  { %v778_v13 = vadd.f32 1e-05, %v776_v12 }
 0x87f   :  { %1241 = vrsqrt.f32 %v778_v13 }
 0x885   :  { %v1240_v16 = vpop.eup %1239 }
 0x886   :  { %v781_v18 = vmul.f32 %v1240_v16, %v765_v58 }
 0x888   :  { %v787_v21 = vmul.f32 %v786_v17, %v781_v18 }
 0x889   :  { %v1242_v20 = vpop.eup %1241 }
 0x88a   :  { %v782_v22 = vmul.f32 %v1242_v20, %v766_v59  ;;  %v793_v27 = vadd.f32 %v792_v23, %v787_v21 }
 0x88c   :  { %v788_v25 = vmul.f32 %v786_v17, %v782_v22 }
 0x88e   :  { %v794_v28 = vadd.f32 %v792_v23, %v788_v25 }
 0x890   :  { %v795_v29 = vpack.c.bf16 %v794_v28, %v793_v27 }
 0x892   :  { %1124 = vmatmul.mubr.msk.bf16.vlgmr.msra.gmra.mrb[24].mxu0 %vm34_vm0, %v795_v29 }
 0x965   :  { %v856_v33 = vpop.f32.mrb[24].mxu0 }
 0x966   :  { %v857_v34 = vadd.f32 %v1009_v32, %v856_v33  ;;  %v1125_v35 = vpop.f32.mrb[25].mxu0 }
 0x967   :  { %v859_v36 = vpop.f32.mrb[26].mxu0 }
 0x968   :  { %v860_v37 = vadd.f32 %v1009_v32, %v859_v36  ;;  %v1126_v38 = vpop.f32.mrb[27].mxu0  ;;  %v863_v39 = vmax.f32 %v857_v34, 0.0 }
 0x96a   :  { %v864_v51 = vmax.f32 %v860_v37, 0.0 }
 0x96c   :  { %v865_v56 = vpack.c.bf16 %v864_v51, %v863_v39 }
 0x96e   :  { %1144 = vmatmul.mubr.bf16.vlgmr.msra.gmra.mrb[16].mxu1 %v865_v56 }
 0xa41   :  { %v968_v52 = vpop.f32.mrb[16].mxu1 }
 0xa42   :  { %v969_v41 = vadd.f32 %v968_v52, %v885_v40  ;;  %v1145_v42 = vpop.f32.mrb[17].mxu1 }
 0xa43   :  { %v971_v43 = vpop.f32.mrb[18].mxu1 }
 0xa44   :  { %v975_v45 = vadd.f32 %v969_v41, %v1471_v46  ;;  %v972_v47 = vadd.f32 %v971_v43, %v885_v40  ;;  %v1146_v48 = vpop.f32.mrb[19].mxu1 }
 0xa46   :  { %977 = vst.msk [vmem:[#allocation2] sm:$0xff] %vm34_vm0, %v975_v45  ;;  %v976_v50 = vadd.f32 %v972_v47, %v1474_v49 }
 0xa48   :  { %978 = vst.msk [vmem:[#allocation2 + $0x8] sm:$0xff] %vm34_vm0, %v976_v50 }
 0xa49   :  { %1254 = shalt.err (!%p1251_p4)
}
 0xa4a   :  { %s1255_s25 = scalar_lea.hbm %s1557_s8, 256 }
 0xa4b   :  { %p1256_p5 = scmp.ne.s32.totalorder %s1557_s8, %s1255_s25  ;;  %p1259_p6 = scmp.lt.u32.totalorder %s1255_s25, %s1557_s8 }
 0xa4d   :  { %p1261_p7 = pnand %p1259_p6, %p1256_p5 }
 0xa4f   :  { %1264 = shalt.err (!%p1261_p7)
}
 0xa50   :  { %s1278_s29 = smov 128  }
 0xa51   :  { %990 = dma.vmem_to_hbm [thread:$0]  %s985_s6, 256, %s1557_s8, [#allocation3], %s1278_s29, %s1278_s29, %s1274_s24  }
 0xa52   :  { %1265 = dma.done.wait [#allocation3], 256  }
 0xa53   :  { %1266 = vsyncadd [#allocation3], 4294967040 }
 0xa54   :  { %994 = vsyncpa [#allocation3], 1 }

</bundles_post_ra>
